<compile_context>
chip_gen: v7x
topology: tpu7x:2x2x1
jax: 0.10.0
libtpu: 0.0.40
codegen_flags: <defaults>
</compile_context>

<pallas_src>
import math

import jax
import jax.numpy as jnp
import numpy as np
from jax.experimental import pallas as pl
from jax.experimental.pallas import tpu as pltpu

BN_EPS = 1e-5
NORM_EPS = 1e-12  # F.normalize default eps


def _netvlad_kernel(x_ref, mask_ref, clusters_ref, clusters2t_ref, bn_ref,
                    vlad_ref, assign_ref):
  # x_ref:          (TB, N, D)   bf16  -- current batch tile
  # mask_ref:       (TB, 1, N)   f32   -- mask, lane-major (N last)
  # clusters_ref:   (D, K)       bf16
  # clusters2t_ref: (K, D)       f32   -- clusters2 pre-transposed
  # bn_ref:         (4, K)       f32   -- [gamma, beta, running_mean, running_var]
  # vlad_ref:       (TB, K-1, D) f32   -- output, lane-dense (D last)
  # assign_ref:     (TB, K, N)   bf16  -- output, lane-dense (N last), already
  #                                       in the torch (B, K, N) orientation
  TB, N, D = x_ref.shape
  K = clusters_ref.shape[1]

  x = x_ref[...]                                   # (TB, N, D) bf16
  mask_row = mask_ref[...]                         # (TB, 1, N) f32
  clusters = clusters_ref[...]                     # (D, K)  bf16
  clusters2_t = clusters2t_ref[...]                # (K, D)  f32
  bn = bn_ref[...]                                 # (4, K)  f32
  gamma, beta, r_mean, r_var = bn[0:1], bn[1:2], bn[2:3], bn[3:4]

  # assignment logits = x @ clusters, fused over the whole batch tile
  # (MXU, bf16 operands, f32 accumulation).
  x2 = x.reshape(TB * N, D)                        # free relabel when N % 8 == 0
  logits = jnp.dot(x2, clusters, preferred_element_type=jnp.float32)  # (TB*N, K)

  # BatchNorm1d over the cluster channel (inference mode, running stats).
  # TODO(synk): PyTorch training-mode BN (batch statistics + running-stat
  # updates) is not reproduced; eval-mode semantics are implemented.
  logits = (logits - r_mean) * jax.lax.rsqrt(r_var + BN_EPS) * gamma + beta

  # softmax over clusters (last / lane dim); reciprocal on the EUP.
  logits = logits - jnp.max(logits, axis=-1, keepdims=True)
  e = jnp.exp(logits)
  p = e * pl.reciprocal(jnp.sum(e, axis=-1, keepdims=True), approx=True)

  # One XLU transpose to the torch output orientation (K, N):
  #   - assignment store becomes lane-dense (N last)
  #   - mask broadcasts across the K sublanes
  #   - a_sum becomes a plain lane reduce (no ones-column matmul)
  assign_t = jnp.transpose(p.reshape(TB, N, K), (0, 2, 1))    # (TB, K, N) f32

  # masked_fill(mask == 0, 0)
  assign_t = jnp.where(mask_row != 0.0, assign_t, 0.0)        # (TB, K, N)
  assign_ref[...] = assign_t.astype(assign_ref.dtype)         # bf16 store

  # vlad[b] = assignment[b] @ x[b] -> (TB, K, D); bf16 operands on the MXU.
  vlad = jax.lax.dot_general(
      assign_t.astype(jnp.bfloat16), x,
      dimension_numbers=(((2,), (1,)), ((0,), (0,))),
      preferred_element_type=jnp.float32)                     # (TB, K, D)

  # a_sum: masked assignment summed over N (lane reduce), already (K, 1).
  a_sum = jnp.sum(assign_t, axis=-1, keepdims=True)           # (TB, K, 1)
  vlad = vlad - a_sum * clusters2_t[None, :, :]               # (TB, K, D)

  # drop the ghost cluster (row slice; output stays lane-dense).
  vlad = vlad[:, :K - 1, :]                                   # (TB, K-1, D)

  # intra-normalization: F.normalize over the feature axis D (last axis here;
  # == dim=1 of the torch (B, D, K-1) tensor).
  ss1 = jnp.sum(vlad * vlad, axis=-1, keepdims=True)          # (TB, K-1, 1)
  vlad = vlad * jax.lax.rsqrt(jnp.maximum(ss1, NORM_EPS * NORM_EPS))

  # global L2 norm of the flattened per-sample vector (layout-invariant).
  ss2 = jnp.sum(vlad * vlad, axis=(1, 2), keepdims=True)      # (TB, 1, 1)
  vlad = vlad * jax.lax.rsqrt(jnp.maximum(ss2, NORM_EPS * NORM_EPS))

  vlad_ref[...] = vlad


def _pad(v, m):
  return ((v + m - 1) // m) * m


def _per_sample_tile_bytes(N, D, K):
  """Double-buffered VMEM footprint per batch element, INCLUDING the (8, 128)
  sublane/lane padding of each block (fixes the mask-padding accounting bug)."""
  x_b = _pad(N, 8) * _pad(D, 128) * 2          # x tile, bf16
  mask_b = 8 * _pad(N, 128) * 4                # (1, N) f32 lane-major mask row
  assign_b = _pad(K, 8) * _pad(N, 128) * 2     # (K, N) bf16 output
  vlad_b = _pad(K - 1, 8) * _pad(D, 128) * 4   # (K-1, D) f32 output
  return 2 * (x_b + mask_b + assign_b + vlad_b)


def _param_vmem_bytes(D, K):
  return (_pad(D, 8) * _pad(K, 128) * 2        # clusters, bf16
          + _pad(K, 8) * _pad(D, 128) * 4      # clusters2^T, f32
          + 8 * _pad(K, 128) * 4)              # bn (4, K), f32


def _tpu_vmem_and_cores():
  """(physical VMEM bytes per TensorCore, TensorCores per chip)."""
  vmem = None
  try:
    info = pltpu.get_tpu_info()
    for name in ("vmem_capacity_bytes", "vmem_bytes", "vmem_size_bytes"):
      v = getattr(info, name, None)
      if v:
        vmem = int(v)
        break
  except Exception:
    vmem = None
  if vmem is None:
    vmem = 64 << 20            # conservative default: v7x per-core VMEM
  # v7x: 64 MiB/core, 2 TensorCores per chip; v5e/v6e: 128 MiB, 1 TensorCore.
  num_cores = 2 if vmem <= (64 << 20) else 1
  return vmem, num_cores


def _choose_tb(B, N, D, K, vmem_bytes, num_cores):
  """Batch-tile size.

  v5e/v6e (one TC, 128 MiB VMEM): the grid is a serial loop, so use a big
  tile budget (~28 MiB of double-buffered tiles) and never force extra grid
  steps.  v7x (two TCs, 64 MiB VMEM): tighter budget, and prefer a step count
  that is a multiple of the core count so neither TensorCore idles.
  """
  per_b = _per_sample_tile_bytes(N, D, K)
  budget = (28 << 20) if vmem_bytes >= (96 << 20) else (20 << 20)
  max_tb = max(1, budget // max(per_b, 1))
  divisors = [t for t in range(1, B + 1) if B % t == 0 and t <= max_tb]
  if not divisors:
    return 1
  if num_cores > 1:
    aligned = [t for t in divisors if (B // t) % num_cores == 0]
    if aligned:
      return max(aligned)
  return max(divisors)


def netvlad_forward(x, mask, clusters, clusters2, bn_params,
                    flatten_order="torch"):
  """x: (B, N, D), mask: (B, N).

  Returns (vlad, assignment):
    vlad: (B, D*(K-1)) in the exact torch flatten order when
          flatten_order=="torch" (one small wrapper transpose), or the
          zero-copy kernel-native (B, (K-1)*D) flatten when
          flatten_order=="kd" (the permutation is only an index reorder of an
          L2-normalized vector; fold it into the next layer's weights).
    assignment: (B, K, N) masked soft-assignment, bf16, already in the torch
          orientation (no wrapper transpose).
  """
  B, N, D = x.shape
  K = clusters.shape[1]
  vmem_cap, num_cores = _tpu_vmem_and_cores()
  TB = _choose_tb(B, N, D, K, vmem_cap, num_cores)

  # Stream x (the dominant HBM traffic) and the matmul weights in bf16.
  x_bf = x.astype(jnp.bfloat16)
  clusters_bf = clusters.astype(jnp.bfloat16)
  c2t = jnp.transpose(clusters2.reshape(D, K)).astype(jnp.float32)   # (K, D)
  mask_row = mask.reshape(B, 1, N).astype(jnp.float32)               # lane-major

  # VMEM budgeting: double-buffered tiles + params + headroom, capped ~16 MiB
  # below the physical per-core VMEM (112 MiB on v5e/v6e, 48 MiB on v7x).
  needed = TB * _per_sample_tile_bytes(N, D, K) + 2 * _param_vmem_bytes(D, K) + (8 << 20)
  cap = max(32 << 20, vmem_cap - (16 << 20))
  vmem_limit = int(min(cap, max(needed, 32 << 20)))

  param_raw = D * K * 2 + K * D * 4 + 4 * K * 4
  cost = pl.CostEstimate(
      flops=4 * B * N * D * K + 12 * B * N * K,
      transcendentals=B * N * K,
      bytes_accessed=(B * N * D * 2 + B * N * 4 + param_raw
                      + B * (K - 1) * D * 4 + B * K * N * 2))

  vlad3, assign_kn = pl.pallas_call(
      _netvlad_kernel,
      out_shape=(
          jax.ShapeDtypeStruct((B, K - 1, D), jnp.float32),
          jax.ShapeDtypeStruct((B, K, N), jnp.bfloat16),
      ),
      grid_spec=pltpu.PrefetchScalarGridSpec(
          num_scalar_prefetch=0,
          grid=(B // TB,),
          in_specs=[
              # NOTE: if xprof shows exposed DMA at step boundaries on
              # v5e/v6e, add pipeline_mode=pl.Buffered(3) here (VMEM allows;
              # do NOT copy that to v7x's 64 MiB budget without re-checking).
              pl.BlockSpec((TB, N, D), lambda b: (b, 0, 0)),   # x (bf16)
              pl.BlockSpec((TB, 1, N), lambda b: (b, 0, 0)),   # mask row (f32)
              pl.BlockSpec((D, K), lambda b: (0, 0)),          # clusters (bf16)
              pl.BlockSpec((K, D), lambda b: (0, 0)),          # clusters2^T
              pl.BlockSpec((4, K), lambda b: (0, 0)),          # bn params
          ],
          out_specs=[
              pl.BlockSpec((TB, K - 1, D), lambda b: (b, 0, 0)),
              pl.BlockSpec((TB, K, N), lambda b: (b, 0, 0)),
          ],
      ),
      compiler_params=pltpu.CompilerParams(
          dimension_semantics=("parallel",),
          vmem_limit_bytes=vmem_limit),
      cost_estimate=cost,
  )(x_bf, mask_row, clusters_bf, c2t, bn_params)

  if flatten_order == "torch":
    # Exact torch flatten order: (B, K-1, D) -> (B, D, K-1) -> (B, D*(K-1)).
    vlad = jnp.transpose(vlad3, (0, 2, 1)).reshape(B, D * (K - 1))
  else:
    vlad = vlad3.reshape(B, (K - 1) * D)
  return vlad, assign_kn


def _reference(x, mask, clusters, clusters2, bn_params):
  """Pure-JAX f32 reference mirroring the PyTorch forward (eval-mode BN)."""
  B, N, D = x.shape
  K = clusters.shape[1]
  gamma, beta, r_mean, r_var = bn_params
  a = x.reshape(-1, D) @ clusters
  a = (a - r_mean) / jnp.sqrt(r_var + BN_EPS) * gamma + beta
  a = jax.nn.softmax(a, axis=1).reshape(B, N, K)
  a = jnp.where(mask[:, :, None] != 0, a, 0.0)
  a_sum = a.sum(axis=1, keepdims=True)
  aa = a_sum * clusters2
  a_t = jnp.transpose(a, (0, 2, 1))
  vlad = jnp.einsum("bkn,bnd->bkd", a_t, x)
  vlad = jnp.transpose(vlad, (0, 2, 1)) - aa
  vlad = vlad[:, :, :-1]
  vlad = vlad / jnp.maximum(
      jnp.sqrt((vlad ** 2).sum(axis=1, keepdims=True)), NORM_EPS)
  vlad = vlad.reshape(B, D * (K - 1))
  vlad = vlad / jnp.maximum(
      jnp.sqrt((vlad ** 2).sum(axis=1, keepdims=True)), NORM_EPS)
  return vlad, a_t


if __name__ == "__main__":
  # Small but layout-exercising shapes: N % 8 == 0 and D % 128 == 0 so the
  # in-kernel leading-dim reshapes are free relabels (as in production).
  B, N = 2, 16                # batch, num_features
  D, K = 128, 8               # feature_size, cluster_size

  key = jax.random.PRNGKey(0)
  k_x, k_m, k_c, k_c2 = jax.random.split(key, 4)

  x = jax.random.normal(k_x, (B, N, D), dtype=jnp.float32)
  mask = (jax.random.uniform(k_m, (B, N)) > 0.3).astype(jnp.float32)

  # Deterministic parameter init (mirrors __init__ shapes / scale).
  init_sc = 1.0 / math.sqrt(D)
  clusters = init_sc * jax.random.normal(k_c, (D, K), dtype=jnp.float32)
  clusters2 = init_sc * jax.random.normal(k_c2, (1, D, K), dtype=jnp.float32)
  # BatchNorm1d(K) defaults: gamma=1, beta=0, running_mean=0, running_var=1
  bn_params = jnp.stack([
      jnp.ones((K,), jnp.float32),    # gamma
      jnp.zeros((K,), jnp.float32),   # beta
      jnp.zeros((K,), jnp.float32),   # running_mean
      jnp.ones((K,), jnp.float32),    # running_var
  ], axis=0)                          # (4, K)

  vlad, assign = jax.jit(netvlad_forward)(x, mask, clusters, clusters2, bn_params)
  jax.block_until_ready((vlad, assign))

  vlad_ref, assign_ref = _reference(
      x, mask, clusters, clusters2,
      (bn_params[0], bn_params[1], bn_params[2], bn_params[3]))
  np.testing.assert_allclose(np.asarray(vlad), np.asarray(vlad_ref),
                             rtol=1e-2, atol=1e-2)
  np.testing.assert_allclose(np.asarray(assign).astype(np.float32),
                             np.asarray(assign_ref),
                             rtol=1e-2, atol=1e-2)

  print("KERNEL_OK")
</pallas_src>

<mosaic_0001>
module attributes {stable_mosaic.version = 11 : i64} {
  func.func @_netvlad_kernel(%arg0: i32, %arg1: memref<1x16x128xbf16, #tpu.memory_space<vmem>>, %arg2: memref<1x1x16xf32, #tpu.memory_space<vmem>>, %arg3: memref<128x8xbf16, #tpu.memory_space<vmem>>, %arg4: memref<8x128xf32, #tpu.memory_space<vmem>>, %arg5: memref<4x8xf32, #tpu.memory_space<vmem>>, %arg6: memref<1x7x128xf32, #tpu.memory_space<vmem>>, %arg7: memref<1x8x16xbf16, #tpu.memory_space<vmem>>) attributes {dimension_semantics = [#tpu.dimension_semantics<parallel>], iteration_bounds = array<i64: 2>, scalar_prefetch = 0 : i64, scratch_operands = 0 : i64, tpu.core_type = #tpu.core_type<tc>, window_params = [{transform_indices = @transform_0, window_bounds = array<i64: 1, 16, 128>}, {transform_indices = @transform_1, window_bounds = array<i64: 1, 1, 16>}, {pipeline_mode = #tpu.pipeline_mode<synchronous>, transform_indices = @transform_2, window_bounds = array<i64: 128, 8>}, {pipeline_mode = #tpu.pipeline_mode<synchronous>, transform_indices = @transform_3, window_bounds = array<i64: 8, 128>}, {pipeline_mode = #tpu.pipeline_mode<synchronous>, transform_indices = @transform_4, window_bounds = array<i64: 4, 8>}, {transform_indices = @transform_5, window_bounds = array<i64: 1, 7, 128>}, {transform_indices = @transform_6, window_bounds = array<i64: 1, 8, 16>}]} {
    %c0 = arith.constant 0 : index
    %c0_0 = arith.constant 0 : index
    %c0_1 = arith.constant 0 : index
    %0 = vector.load %arg1[%c0, %c0_0, %c0_1] : memref<1x16x128xbf16, #tpu.memory_space<vmem>>, vector<1x16x128xbf16>
    %c0_2 = arith.constant 0 : index
    %c0_3 = arith.constant 0 : index
    %c0_4 = arith.constant 0 : index
    %1 = vector.load %arg2[%c0_2, %c0_3, %c0_4] : memref<1x1x16xf32, #tpu.memory_space<vmem>>, vector<1x1x16xf32>
    %c0_5 = arith.constant 0 : index
    %c0_6 = arith.constant 0 : index
    %2 = vector.load %arg3[%c0_5, %c0_6] : memref<128x8xbf16, #tpu.memory_space<vmem>>, vector<128x8xbf16>
    %c0_7 = arith.constant 0 : index
    %c0_8 = arith.constant 0 : index
    %3 = vector.load %arg4[%c0_7, %c0_8] : memref<8x128xf32, #tpu.memory_space<vmem>>, vector<8x128xf32>
    %c0_9 = arith.constant 0 : index
    %c0_10 = arith.constant 0 : index
    %4 = vector.load %arg5[%c0_9, %c0_10] : memref<4x8xf32, #tpu.memory_space<vmem>>, vector<4x8xf32>
    %5 = vector.extract_strided_slice %4 {offsets = [0, 0], sizes = [1, 8], strides = [1, 1]} : vector<4x8xf32> to vector<1x8xf32>
    %6 = vector.extract_strided_slice %4 {offsets = [1, 0], sizes = [1, 8], strides = [1, 1]} : vector<4x8xf32> to vector<1x8xf32>
    %7 = vector.extract_strided_slice %4 {offsets = [2, 0], sizes = [1, 8], strides = [1, 1]} : vector<4x8xf32> to vector<1x8xf32>
    %8 = vector.extract_strided_slice %4 {offsets = [3, 0], sizes = [1, 8], strides = [1, 1]} : vector<4x8xf32> to vector<1x8xf32>
    %9 = vector.shape_cast %0 : vector<1x16x128xbf16> to vector<16x128xbf16>
    %cst = arith.constant dense<0.000000e+00> : vector<16x8xf32>
    %10 = tpu.matmul %9, %2, %cst {dimension_numbers = #tpu.dot_dimension_numbers<[1], [0], [0], [1], [0, 0, 1, 1], [], []>} : vector<16x128xbf16>, vector<128x8xbf16>, vector<16x8xf32> -> vector<16x8xf32>
    %11 = vector.broadcast %7 : vector<1x8xf32> to vector<16x8xf32>
    %12 = arith.subf %10, %11 : vector<16x8xf32>
    %cst_11 = arith.constant 9.99999974E-6 : f32
    %13 = vector.broadcast %cst_11 : f32 to vector<1x8xf32>
    %14 = arith.addf %8, %13 : vector<1x8xf32>
    %15 = math.rsqrt %14 : vector<1x8xf32>
    %16 = vector.broadcast %15 : vector<1x8xf32> to vector<16x8xf32>
    %17 = arith.mulf %12, %16 : vector<16x8xf32>
    %18 = vector.broadcast %5 : vector<1x8xf32> to vector<16x8xf32>
    %19 = arith.mulf %17, %18 : vector<16x8xf32>
    %20 = vector.broadcast %6 : vector<1x8xf32> to vector<16x8xf32>
    %21 = arith.addf %19, %20 : vector<16x8xf32>
    %cst_12 = arith.constant dense<0xFF800000> : vector<16xf32>
    %22 = vector.multi_reduction <maximumf>, %21, %cst_12 [1] : vector<16x8xf32> to vector<16xf32>
    %23 = vector.shape_cast %22 : vector<16xf32> to vector<16x1xf32>
    %24 = vector.broadcast %23 : vector<16x1xf32> to vector<16x8xf32>
    %25 = arith.subf %21, %24 : vector<16x8xf32>
    %26 = math.exp %25 : vector<16x8xf32>
    %cst_13 = arith.constant dense<0.000000e+00> : vector<16xf32>
    %27 = vector.multi_reduction <add>, %26, %cst_13 [1] : vector<16x8xf32> to vector<16xf32>
    %28 = vector.shape_cast %27 : vector<16xf32> to vector<16x1xf32>
    %29 = tpu.reciprocal %28 {approx = true} : vector<16x1xf32> -> vector<16x1xf32>
    %30 = vector.broadcast %29 : vector<16x1xf32> to vector<16x8xf32>
    %31 = arith.mulf %26, %30 : vector<16x8xf32>
    %32 = vector.shape_cast %31 : vector<16x8xf32> to vector<1x16x8xf32>
    %33 = tpu.transpose %32, [0, 2, 1] : vector<1x16x8xf32> -> vector<1x8x16xf32>
    %cst_14 = arith.constant 0.000000e+00 : f32
    %34 = vector.broadcast %cst_14 : f32 to vector<1x1x16xf32>
    %35 = arith.cmpf one, %1, %34 : vector<1x1x16xf32>
    %cst_15 = arith.constant 0.000000e+00 : f32
    %36 = vector.shape_cast %35 : vector<1x1x16xi1> to vector<1x1x16xi1>
    %37 = vector.broadcast %36 : vector<1x1x16xi1> to vector<1x8x16xi1>
    %38 = vector.broadcast %cst_15 : f32 to vector<1x8x16xf32>
    %39 = arith.select %37, %33, %38 : vector<1x8x16xi1>, vector<1x8x16xf32>
    %40 = arith.truncf %39 : vector<1x8x16xf32> to vector<1x8x16xbf16>
    %c0_16 = arith.constant 0 : index
    %c0_17 = arith.constant 0 : index
    %c0_18 = arith.constant 0 : index
    %41 = vector.load %arg7[%c0_16, %c0_17, %c0_18] : memref<1x8x16xbf16, #tpu.memory_space<vmem>>, vector<1x8x16xbf16>
    tpu.vector_store %arg7[%c0_16, %c0_17, %c0_18], %40 {strides = array<i32>} : memref<1x8x16xbf16, #tpu.memory_space<vmem>>, vector<1x8x16xbf16>,
    %42 = arith.truncf %39 : vector<1x8x16xf32> to vector<1x8x16xbf16>
    %cst_19 = arith.constant dense<0.000000e+00> : vector<1x8x128xf32>
    %43 = tpu.matmul %42, %0, %cst_19 {dimension_numbers = #tpu.dot_dimension_numbers<[2], [1], [1], [2], [0, 0, 0, 1, 1, 2], [0], [0]>} : vector<1x8x16xbf16>, vector<1x16x128xbf16>, vector<1x8x128xf32> -> vector<1x8x128xf32>
    %cst_20 = arith.constant dense<0.000000e+00> : vector<1x8xf32>
    %44 = vector.multi_reduction <add>, %39, %cst_20 [2] : vector<1x8x16xf32> to vector<1x8xf32>
    %45 = vector.shape_cast %44 : vector<1x8xf32> to vector<1x8x1xf32>
    %46 = vector.shape_cast %3 : vector<8x128xf32> to vector<1x8x128xf32>
    %47 = vector.broadcast %45 : vector<1x8x1xf32> to vector<1x8x128xf32>
    %48 = arith.mulf %47, %46 : vector<1x8x128xf32>
    %49 = arith.subf %43, %48 : vector<1x8x128xf32>
    %50 = vector.extract_strided_slice %49 {offsets = [0, 0, 0], sizes = [1, 7, 128], strides = [1, 1, 1]} : vector<1x8x128xf32> to vector<1x7x128xf32>
    %51 = arith.mulf %50, %50 : vector<1x7x128xf32>
    %cst_21 = arith.constant dense<0.000000e+00> : vector<1x7xf32>
    %52 = vector.multi_reduction <add>, %51, %cst_21 [2] : vector<1x7x128xf32> to vector<1x7xf32>
    %53 = vector.shape_cast %52 : vector<1x7xf32> to vector<1x7x1xf32>
    %cst_22 = arith.constant 1.000000e-24 : f32
    %54 = vector.broadcast %cst_22 : f32 to vector<1x7x1xf32>
    %55 = arith.maximumf %53, %54 : vector<1x7x1xf32>
    %56 = math.rsqrt %55 : vector<1x7x1xf32>
    %57 = vector.broadcast %56 : vector<1x7x1xf32> to vector<1x7x128xf32>
    %58 = arith.mulf %50, %57 : vector<1x7x128xf32>
    %59 = arith.mulf %58, %58 : vector<1x7x128xf32>
    %cst_23 = arith.constant dense<0.000000e+00> : vector<1xf32>
    %60 = vector.multi_reduction <add>, %59, %cst_23 [1, 2] : vector<1x7x128xf32> to vector<1xf32>
    %61 = vector.shape_cast %60 : vector<1xf32> to vector<1x1x1xf32>
    %cst_24 = arith.constant 1.000000e-24 : f32
    %62 = vector.broadcast %cst_24 : f32 to vector<1x1x1xf32>
    %63 = arith.maximumf %61, %62 : vector<1x1x1xf32>
    %64 = math.rsqrt %63 : vector<1x1x1xf32>
    %65 = vector.broadcast %64 : vector<1x1x1xf32> to vector<1x7x128xf32>
    %66 = arith.mulf %58, %65 : vector<1x7x128xf32>
    %c0_25 = arith.constant 0 : index
    %c0_26 = arith.constant 0 : index
    %c0_27 = arith.constant 0 : index
    %67 = vector.load %arg6[%c0_25, %c0_26, %c0_27] : memref<1x7x128xf32, #tpu.memory_space<vmem>>, vector<1x7x128xf32>
    tpu.vector_store %arg6[%c0_25, %c0_26, %c0_27], %66 {strides = array<i32>} : memref<1x7x128xf32, #tpu.memory_space<vmem>>, vector<1x7x128xf32>,
    return
  }
  func.func @transform_0(%arg0: i32) -> (i32, i32, i32) {
    %c0_i32 = arith.constant 0 : i32
    %c0_i32_0 = arith.constant 0 : i32
    %c0_i32_1 = arith.constant 0 : i32
    return %arg0, %c0_i32, %c0_i32_0 : i32, i32, i32
  }
  func.func @transform_1(%arg0: i32) -> (i32, i32, i32) {
    %c0_i32 = arith.constant 0 : i32
    %c0_i32_0 = arith.constant 0 : i32
    %c0_i32_1 = arith.constant 0 : i32
    return %arg0, %c0_i32, %c0_i32_0 : i32, i32, i32
  }
  func.func @transform_2(%arg0: i32) -> (i32, i32) {
    %c0_i32 = arith.constant 0 : i32
    %c0_i32_0 = arith.constant 0 : i32
    %c0_i32_1 = arith.constant 0 : i32
    return %c0_i32, %c0_i32_0 : i32, i32
  }
  func.func @transform_3(%arg0: i32) -> (i32, i32) {
    %c0_i32 = arith.constant 0 : i32
    %c0_i32_0 = arith.constant 0 : i32
    %c0_i32_1 = arith.constant 0 : i32
    return %c0_i32, %c0_i32_0 : i32, i32
  }
  func.func @transform_4(%arg0: i32) -> (i32, i32) {
    %c0_i32 = arith.constant 0 : i32
    %c0_i32_0 = arith.constant 0 : i32
    %c0_i32_1 = arith.constant 0 : i32
    return %c0_i32, %c0_i32_0 : i32, i32
  }
  func.func @transform_5(%arg0: i32) -> (i32, i32, i32) {
    %c0_i32 = arith.constant 0 : i32
    %c0_i32_0 = arith.constant 0 : i32
    %c0_i32_1 = arith.constant 0 : i32
    return %arg0, %c0_i32, %c0_i32_0 : i32, i32, i32
  }
  func.func @transform_6(%arg0: i32) -> (i32, i32, i32) {
    %c0_i32 = arith.constant 0 : i32
    %c0_i32_0 = arith.constant 0 : i32
    %c0_i32_1 = arith.constant 0 : i32
    return %arg0, %c0_i32, %c0_i32_0 : i32, i32, i32
  }
}

</mosaic_0001>

<bundles_post_ra>
// kernel: netvlad_forward.1
= control target key start
LH: loop header
LB: loop body
LE: loop exit
PB: predicated region body
PF: predicated region fallthrough
CT: control target
= control target key end

     0   :  { %12 = vsyncpa [#allocation3], 0  ;;  %s1045_s0 = inlined_call_operand.vmem [shape: bf16[2,16,128], index: 0, kind: input, shape index: {}]   ;;  %s1046_s1 = inlined_call_operand.vmem [shape: f32[2,1,16], index: 1, kind: input, shape index: {}]   ;;  %s1047_s2 = inlined_call_operand.vmem [shape: bf16[128,8], index: 2, kind: input, shape index: {}]   ;;  %s1048_s3 = inlined_call_operand.vmem [shape: f32[8,128], index: 3, kind: input, shape index: {}]   ;;  %s1049_s4 = inlined_call_operand.vmem [shape: f32[4,8], index: 4, kind: input, shape index: {}]   ;;  %s1050_s5 = inlined_call_operand.vmem [shape: f32[2,7,128], index: 5, kind: output, shape index: {0}]   ;;  %s1051_s6 = inlined_call_operand.hbm [shape: bf16[2,8,16], index: 6, kind: output, shape index: {1}]  }
   0x1   :  { %14 = vsyncpa [#allocation3 + $0x1], 0  ;;  %s896_s21 = smov 0   ;;  %s898_s22 = smov 0  }
   0x2   :  { %s900_s23 = smov 0   ;;  %s902_s24 = smov 0  }
   0x3 LB: > { %s917_s25 = sadd.s32 4294967295, %s855_s24   ;;  %s668_s26 = sadd.s32 4294967294, %s855_s24   ;;  %s855_s24 = sphi %s902_s24, %s1057_s24   ;;  %s851_s23 = sphi %s900_s23, %s1056_s23   ;;  %s847_s22 = sphi %s898_s22, %s1055_s22   ;;  %s843_s21 = sphi %s896_s21, %s1054_s21  }
   0x4   : > { %s921_s27 = sadd.s32 1, %s855_s24   ;;  %s168_s28 = sadd.s32 1, %s851_s23 }
   0x5   : > { %s165_s29 = ssub.s32 %s855_s24, %s921_s27  ;;  %p178_p0 = scmp.ne.s32.totalorder %s851_s23, %s847_s22 }
   0x6   : > { %p166_p1 = scmp.eq.s32.totalorder %s165_s29, 0  ;;  %p179_p2 = scmp.eq.s32.totalorder %s917_s25, 1 }
   0x7   : > { %p184_p3 = scmp.ne.s32.totalorder %s847_s22, %s843_s21  ;;  %p185_p4 = scmp.eq.s32.totalorder %s668_s26, 1 }
   0x8   : > { %s932_s30 = scalar_select %p166_p1, %s851_s23, %s168_s28  }
   0x9   : > { %p934_p5 = por %p179_p2, %p178_p0  ;;  %p938_p6 = por %p185_p4, %p184_p3 }
   0xa   : > { %p671_p7 = scmp.ge.s32.totalorder %s855_s24, 1  ;;  %p226_p8 = scmp.lt.s32.totalorder %s855_s24, 3 }
   0xc   : > { %p227_p9 = pnand %p671_p7, %p226_p8 }
   0xd   : > { %v770_v0 = vld [vmem:[%s1047_s2] sm:$0xff] (!%p227_p9)   ;;  %v857_v1 = vmov (!%p227_p9), 0.0   ;;  %v771_v2 = vld [vmem:[%s1047_s2 + $0x8] sm:$0xff] (!%p227_p9)   ;;  %vm858_vm0 = vmmov (!%p227_p9), 0   ;;  %p263_p10 = scmp.lt.s32.totalorder (!%p227_p9), %s917_s25, 1  ;;  %v772_v3 = vld [vmem:[%s1047_s2 + $0x10] sm:$0xff] (!%p227_p9)   ;;  %v392_v12 = vlaneseq (!%p227_p9) }
   0xe   : > { %230 = sbr.rel (%p227_p9) target bundleno = 1259 (0x4eb), region = 40  ;;  %702 = vmatprep.subr.bf16.mxu0 (!%p227_p9), %v857_v1  ;;  %722 = vmatprep.subr.bf16.mxu1 (!%p227_p9), %v857_v1  ;;  %v773_v5 = vld [vmem:[%s1047_s2 + $0x18] sm:$0xff] (!%p227_p9)   ;;  %v774_v6 = vld [vmem:[%s1047_s2 + $0x20] sm:$0xff] (!%p227_p9)   ;;  %v775_v7 = vld [vmem:[%s1047_s2 + $0x28] sm:$0xff] (!%p227_p9)   ;;  %vm418_vm1 = vcmask (!%p227_p9), 64512   ;;  %v859_v54 = vmov (!%p227_p9), 0  }
   0xf   : > { %703 = vmatpush3.bf16.msra.mxu0 (!%p227_p9), %v770_v0  ;;  %718 = vmatprep.mubr.msk.bf16.mxu0 (!%p227_p9), %vm858_vm0, %v857_v1  ;;  %v776_v8 = vld [vmem:[%s1047_s2 + $0x30] sm:$0xff] (!%p227_p9)   ;;  %v777_v9 = vld [vmem:[%s1047_s2 + $0x38] sm:$0xff] (!%p227_p9)   ;;  %v296_v10 = vld [vmem:[%s1049_s4] sm:$0xf] (!%p227_p9)  ;;  %v393_v13 = vshrl.u32 (!%p227_p9), %v392_v12, 7  ;;  %s260_s28 = sand.u32 (!%p227_p9), 1, %s847_s22  }
  0x10   : > { %704 = vmatprep.subr.bf16.mxu0 (!%p227_p9), %v857_v1  ;;  %724 = vmatprep.mubr.msk.bf16.mxu1 (!%p227_p9), %vm858_vm0, %v857_v1  ;;  %v398_v11 = vadd.f32 (!%p227_p9), 1e-05, %v296_v10  ;;  %s992_s29 = sshll.u32 (!%p227_p9), %s260_s28, 2  ;;  %vm484_vm4 = vcmask (!%p227_p9), 130048   ;;  %vm482_vm5 = vcmask (!%p227_p9), 125952   ;;  %v295_v61 = vld [vmem:[%s1048_s3] sm:$0xff] (!%p227_p9) }
  0x11   : > { %v394_v14 = vsub.s32 (!%p227_p9), 2, %v393_v13  ;;  %v402_v15 = vsub.s32 (!%p227_p9), 3, %v393_v13  ;;  %v408_v18 = vsub.s32 (!%p227_p9), 0, %v393_v13  ;;  %v414_v20 = vsub.s32 (!%p227_p9), 1, %v393_v13  ;;  %s262_s9 = scalar_lea.vmem (!%p227_p9), [#allocation2], %s992_s29  ;;  %s687_s12 = sshll.u32 (!%p227_p9), %s917_s25, 6 }
  0x12   : > { %779 = vrsqrt.f32 (!%p227_p9), %v398_v11  ;;  %vm534_vm6 = vcmask (!%p227_p9), 1046528   ;;  %s576_s14 = sshll.u32 (!%p227_p9), %s262_s9, 4  ;;  %s1002_s18 = scalar_lea.hbm (!%p227_p9), %s1051_s6, %s687_s12  ;;  %s577_s14 = int_to_ptr.vmem [resolvable:$true] %s576_s14 }
  0x13   : > { %705 = vmatpush3.bf16.msra.mxu0 (!%p227_p9), %v771_v2  ;;  %v395_v17 = vrot.slane (!%p227_p9), %v296_v10, %v394_v14  ;;  %v409_v24 = vrot.slane (!%p227_p9), %v296_v10, %v408_v18  ;;  %v415_v29 = vrot.slane (!%p227_p9), %v296_v10, %v414_v20  ;;  %s793_s20 = scalar_lea.vmem (!%p227_p9), %s577_s14, 64 }
  0x14   : > { %706 = vmatprep.subr.bf16.mxu0 (!%p227_p9), %v857_v1  ;;  %p794_p11 = scmp.ne.s32.totalorder (!%p227_p9), %s577_s14, %s793_s20 }
  0x15   : > { %s952_s13 = scalar_select %p263_p10, %s917_s25, 1 }
  0x16   : > { %p795_p12 = pnand %p794_p11, %p934_p5 }
  0x17   : > { %s690_s16 = sshll.u32 %s952_s13, 3  ;;  %707 = vmatpush3.bf16.msra.mxu0 %v772_v3  ;;  %s270_s26 = scalar_lea.vmem %s1046_s1, %s952_s13 }
  0x18   : > { %s267_s19 = scalar_lea.vmem %s1045_s0, %s690_s16  ;;  %708 = vmatprep.subr.bf16.mxu0 %v857_v1  ;;  %v278_v53 = vld [vmem:[%s270_s26] sm:$0x1]  ;;  %p796_p13 = pneg %p795_p12 }
  0x19   : > { %v778_v4 = vld [vmem:[%s267_s19] sm:$0xff]   ;;  %vm473_vm2 = vcmp.ne.f32.partialorder %v278_v53, 0.0  ;;  %s560_s19 = scalar_lea.sflag [#allocation3], %s260_s28  ;;  %s860_s26 = smov [#allocation2]  }
  0x1a   : > { %723 = vmatpush3.bf16.msra.mxu1 %v778_v4  ;;  %v474_v55 = vsel %vm473_vm2, 1, %v859_v54  ;;  %s797_s29 = sshll.u32 %s860_s26, 4  ;;  %s798_s29 = int_to_ptr.vmem [resolvable:$false] %s797_s29 }
  0x1b   : > { %709 = vmatpush3.bf16.msra.mxu0 %v773_v5  ;;  %v478_v56 = vrot.slane %v474_v55, %v408_v18  ;;  %s799_s10 = scalar_lea.vmem %s798_s29, 128  ;;  %p800_p0 = scmp.lt.s32.totalorder %s577_s14, %s798_s29 }
  0x1c   : > { %710 = vmatprep.subr.bf16.mxu0 %v857_v1  ;;  %v780_v16 = vpop.eup %779  ;;  %p801_p1 = scmp.lt.s32.totalorder %s799_s10, %s793_s20 }
  0x1d   : > { %v403_v19 = vrot.slane %v780_v16, %v402_v15  ;;  %vm479_vm3 = vcmp.eq.s32.totalorder %v478_v56, 1 }
  0x1e   : > { %p802_p2 = por %p801_p1, %p800_p0 }
  0x1f   : > { %711 = vmatpush3.bf16.msra.mxu0 %v774_v6 }
  0x20   : > { %712 = vmatprep.subr.bf16.mxu0 %v857_v1  ;;  %p803_p3 = pnand %p802_p2, %p796_p13 }
  0x23   : > { %713 = vmatpush3.bf16.msra.mxu0 %v775_v7 }
  0x24   : > { %714 = vmatprep.subr.bf16.mxu0 %v857_v1 }
  0x27   : > { %715 = vmatpush3.bf16.msra.mxu0 %v776_v8 }
  0x28   : > { %716 = vmatprep.subr.bf16.mxu0 %v857_v1 }
  0x2b   : > { %717 = vmatpush3.bf16.msra.mxu0 %v777_v9 }
  0x2e   : > { %719 = vmatmul.mubr.bf16.vlgmr.msra.gmra.mrb[0].mxu0 %v778_v4 }
 0x101   : > { %v385_v21 = vpop.f32.mrb[0].mxu0 }
 0x102   : > { %v396_v22 = vsub.f32 %v385_v21, %v395_v17  ;;  %v720_v23 = vpop.f32.mrb[1].mxu0 }
 0x103   : > { %v388_v25 = vpop.f32.mrb[2].mxu0 }
 0x104   : > { %v404_v26 = vmul.f32 %v403_v19, %v396_v22  ;;  %v397_v27 = vsub.f32 %v388_v25, %v395_v17  ;;  %v721_v28 = vpop.f32.mrb[3].mxu0 }
 0x106   : > { %v405_v30 = vmul.f32 %v403_v19, %v397_v27  ;;  %v410_v31 = vmul.f32 %v409_v24, %v404_v26 }
 0x108   : > { %v416_v32 = vadd.f32 %v415_v29, %v410_v31  ;;  %v411_v33 = vmul.f32 %v409_v24, %v405_v30 }
 0x10a   : > { %v419_v34 = vsel %vm418_vm1, %v416_v32, -inf  ;;  %v417_v35 = vadd.f32 %v415_v29, %v411_v33 }
 0x10b   : > { %420 = vmax.xlane.f32.xlu0 %v419_v34 }
 0x10c   : > { %v422_v36 = vsel %vm418_vm1, %v417_v35, -inf }
 0x10f   : > { %423 = vmax.xlane.f32.xlu0 %v422_v36 }
 0x198   : > { %v421_v37 = vpop.xlane.xlu0 %420 }
 0x199   : > { %v425_v38 = vsub.f32 %v416_v32, %v421_v37 }
 0x19b   : > { %v427_v39 = vmul.f32 1.442695, %v425_v38 }
 0x19c   : > { %v424_v40 = vpop.xlane.xlu0 %423 }
 0x19d   : > { %781 = vpow2.f32 %v427_v39  ;;  %v426_v41 = vsub.f32 %v417_v35, %v424_v40 }
 0x19f   : > { %v429_v42 = vmul.f32 1.442695, %v426_v41 }
 0x1a1   : > { %783 = vpow2.f32 %v429_v42 }
 0x1a7   : > { %v782_v43 = vpop.eup %781 }
 0x1a8   : > { %v431_v44 = vsel %vm418_vm1, %v782_v43, 0.0 }
 0x1a9   : > { %432 = vadd.xlane.f32.xlu1 %v431_v44 }
 0x1ab   : > { %v784_v45 = vpop.eup %783 }
 0x1ac   : > { %v434_v46 = vsel %vm418_vm1, %v784_v45, 0.0 }
 0x1ad   : > { %435 = vadd.xlane.f32.xlu1 %v434_v46 }
 0x236   : > { %v433_v47 = vpop.xlane.xlu1 %432 }
 0x237   : > { %785 = vrcp.f32 %v433_v47 }
 0x23a   : > { %v436_v48 = vpop.xlane.xlu1 %435 }
 0x23b   : > { %787 = vrcp.f32 %v436_v48 }
 0x241   : > { %v786_v49 = vpop.eup %785 }
 0x242   : > { %v439_v50 = vmul.f32 %v786_v49, %v782_v43 }
 0x244   : > { %441 = vxpose.xlu0.b32.start [1/2] (short) (narrow) %v439_v50, 8 }
 0x245   : > { %v788_v51 = vpop.eup %787 }
 0x246   : > { %v440_v52 = vmul.f32 %v788_v51, %v784_v45 }
 0x248   : > { %442 = vxpose.xlu0.b32.end [2/2] (short) (narrow) %v440_v52, 8 }
 0x2c4   : > { %v457_v57 = vpop.trf.xlu0 }
 0x2c5   : > { %v480_v58 = vsel %vm479_vm3, %v457_v57, 0.0 }
 0x2c6   : > { %v481_v59 = vpack.c.bf16 %v480_v58, %v480_v58  ;;  %v528_v60 = vsel %vm484_vm4, %v480_v58, 0.0 }
 0x2c7   : > { %529 = vadd.xlane.f32.xlu1 %v528_v60 }
 0x2c8   : > { %725 = vmatmul.mubr.msk.bf16.vlgmr.msra.gmra.mrb[0].mxu1 %vm484_vm4, %v481_v59  ;;  %483 = vst.msk [vmem:[%s262_s9] sm:$0xf] %vm482_vm5, %v481_v59 }
 0x354   : > { %v530_v62 = vpop.xlane.xlu1 %529 }
 0x355   : > { %v531_v63 = vmul.f32 %v530_v62, %v295_v61 }
 0x39b   : > { %v522_v0 = vpop.f32.mrb[0].mxu1 }
 0x39c   : > { %v532_v1 = vsub.f32 %v522_v0, %v531_v63  ;;  %v726_v2 = vpop.f32.mrb[1].mxu1 }
 0x39d   : > { %v525_v3 = vpop.f32.mrb[2].mxu1 }
 0x39e   : > { %v727_v4 = vpop.f32.mrb[3].mxu1  ;;  %v533_v5 = vmul.f32 %v532_v1, %v532_v1 }
 0x3a0   : > { %v535_v6 = vsel %vm534_vm6, %v533_v5, 0.0 }
 0x3a1   : > { %536 = vadd.xlane.f32.xlu1 %v535_v6 }
 0x42e   : > { %v537_v7 = vpop.xlane.xlu1 %536 }
 0x42f   : > { %v538_v8 = vmax.f32 %v537_v7, 1e-24 }
 0x431   : > { %789 = vrsqrt.f32 %v538_v8 }
 0x43b   : > { %v790_v9 = vpop.eup %789 }
 0x43c   : > { %v540_v10 = vmul.f32 %v790_v9, %v532_v1 }
 0x43e   : > { %v541_v11 = vmul.f32 %v540_v10, %v540_v10 }
 0x440   : > { %v542_v12 = vsel %vm534_vm6, %v541_v11, 0.0 }
 0x441   : > { %543 = vadd.xlane.f32.xlu1 %v542_v12 }
 0x442   : > { %806 = shalt.err (!%p803_p3)
}
 0x443   : > { %s807_s25 = scalar_lea.hbm %s1002_s18, 64  ;;  %s811_s11 = scalar_lea.hbm %s1051_s6, 128 }
 0x444   : > { %p808_p4 = scmp.ne.s32.totalorder %s1002_s18, %s807_s25  ;;  %p812_p9 = scmp.lt.u32.totalorder %s1002_s18, %s1051_s6 }
 0x445   : > { %p813_p10 = scmp.lt.u32.totalorder %s811_s11, %s807_s25  ;;  %p815_p12 = scmp.lt.u32.totalorder %s807_s25, %s1002_s18 }
 0x446   : > { %p809_p7 = pnand %p808_p4, %p934_p5 }
 0x447   : > { %p814_p11 = por %p813_p10, %p812_p9 }
 0x448   : > { %p810_p8 = pneg %p809_p7 }
 0x449   : > { %p816_p13 = por %p815_p12, %p814_p11 }
 0x44b   : > { %p817_p0 = pnand %p816_p13, %p810_p8 }
 0x44d   : > { %820 = shalt.err (!%p817_p0)
}
 0x44e   : > { %728 = dma.vmem_to_hbm [thread:$0]  (%p934_p5), %s577_s14, 64, %s1002_s18, %s560_s19  }
 0x44f   : > { %s274_s26 = scalar_lea.vmem %s1050_s5, %s690_s16 }
 0x4ce   : > { %v544_v13 = vpop.xlane.xlu1 %543 }
 0x4cf   : > { %v545_v14 = vrot.slane %v544_v13, 4 }
 0x4d1   : > { %v546_v15 = vadd.f32 %v545_v14, %v544_v13 }
 0x4d3   : > { %v547_v16 = vrot.slane %v546_v15, 2 }
 0x4d5   : > { %v548_v17 = vadd.f32 %v547_v16, %v546_v15 }
 0x4d7   : > { %v549_v18 = vrot.slane %v548_v17, 1 }
 0x4d9   : > { %v550_v19 = vadd.f32 %v549_v18, %v548_v17 }
 0x4db   : > { %v551_v20 = vmax.f32 %v550_v19, 1e-24 }
 0x4dd   : > { %791 = vrsqrt.f32 %v551_v20 }
 0x4e7   : > { %v792_v21 = vpop.eup %791 }
 0x4e8   : > { %v553_v22 = vmul.f32 %v792_v21, %v540_v10 }
 0x4ea   : > { %554 = vst [vmem:[%s274_s26] sm:$0x7f] %v553_v22 }
 0x4eb PF: > { %p734_p5 = scmp.ge.s32.totalorder %s855_s24, 2  ;;  %s595_s7 = sand.u32 1, %s843_s21  }
 0x4ec   : > { %s596_s14 = scalar_lea.sflag [#allocation3], %s595_s7 }
 0x4ed   : > { %p731_p1 = pnand %p734_p5, %p938_p6 }
 0x4ef   : > { %838 = dma.done.wait (!%p731_p1), %s596_s14, 64  }
 0x4f0   : > { %840 = vsyncadd (!%p731_p1), %s596_s14, 4294967232  ;;  %p17_p2 = scmp.ge.s32.totalorder %s921_s27, 4   ;;  %s1054_s21 = smov %s847_s22 }
 0x4f1   : > { %s1055_s22 = smov %s851_s23  ;;  %s1056_s23 = smov %s932_s30 }
 0x4f2   : > { %s1057_s24 = smov %s921_s27  ;;  %19 = sbr.rel (!%p17_p2) target bundleno = 3 (0x3), region = 90 }
 0x4f9   :  { %601 = vsyncpa [#allocation3], 1 }
 0x4fa   :  { %603 = vsyncpa [#allocation3 + $0x1], 1 }

</bundles_post_ra>
